<compile_context>
chip_gen: v6e
topology: v6e:2x2x1
jax: 0.10.0
libtpu: 0.0.40
codegen_flags: <defaults>
</compile_context>

<pallas_src>
import jax
import jax.numpy as jnp
from jax.experimental import pallas as pl
from jax.experimental.pallas import tpu as pltpu


def _round_up(x: int, m: int) -> int:
    return (x + m - 1) // m * m


def _pick_batch_tile(B: int, F: int, x_itemsize: int, w_itemsize: int,
                     budget_bytes: int = 24 << 20, tb_max: int = 32768) -> int:
    """Largest batch tile whose VMEM working set fits the budget.

    Accounts for lane padding of the (TB, F) x block, double-buffered weights,
    and the sublane-padded out row block; then caps TB so large batches keep
    >= 4 grid steps (with a ~1024-row floor so small batches stay single-tile).
    """
    Hp = 128
    Fp = _round_up(max(F, 1), 128)                       # x block is lane-padded in VMEM
    weight_bytes = 2 * (F * Hp) * w_itemsize + 2 * Hp * 4 + 2 * Hp * 4  # W1(2-buf) + b1 + W2 row
    avail = max(budget_bytes - weight_bytes, 0)
    per_row = 2 * Fp * x_itemsize + 2 * 8 * 4            # 2-buf x block + 2-buf (8, TB) out block
    tb = max(8, min(avail // max(per_row, 1), tb_max))
    tb = min(tb, max(1024, _round_up(-(-B // 4), 8)))    # >= 4 steps on large B (v7x dual-TC)
    if B <= tb:
        return B                                          # single block == full dim (always legal)
    tb = (tb // 8) * 8
    if tb >= 128:
        tb = (tb // 128) * 128                            # lane-dense out rows when TB is large
    return max(tb, 8)


def dense_msa_kernel(x_ref, w1_ref, b1_ref, w2_ref, b2_ref, o_ref):
    # hidden = relu(x @ W1 + b1); f32 accumulation on the MXU.
    h = jnp.dot(x_ref[...], w1_ref[...], preferred_element_type=jnp.float32)
    h = jnp.maximum(h + b1_ref[...], 0.0)                 # b1 is (1, Hp) -> broadcasts over batch
    # Dropout(0.2) == identity at inference.
    # out row = w2_row . h^T  -> (1, TB): lane-dense, only real scalars written.
    o = jax.lax.dot_general(w2_ref[...], h,
                            dimension_numbers=(((1,), (1,)), ((), ())),
                            preferred_element_type=jnp.float32)
    o_ref[...] = (o + b2_ref[0]).astype(o_ref.dtype)


def prepare_params(w1, b1, w2, b2, param_dtype=jnp.float32):
    """Pad/lay out weights ONCE (outside the per-call path).

    W1 is padded 100->128 hidden cols in `param_dtype` (bf16 halves the weight
    stream and hits the native MXU bf16 path).  W2 is stored as a single f32
    (1, Hp) row and b2 as an f32 scalar.  Zero padding is exact: padded hidden
    cols get bias 0 -> relu(0)=0, and the matching W2 entries are 0.
    """
    F, H = w1.shape
    Hp = _round_up(H, 128)
    w1p = jnp.zeros((F, Hp), param_dtype).at[:, :H].set(w1.astype(param_dtype))
    b1p = jnp.zeros((1, Hp), jnp.float32).at[0, :H].set(b1.astype(jnp.float32))
    w2p = jnp.zeros((1, Hp), jnp.float32).at[0, :H].set(w2[:, 0].astype(jnp.float32))
    b2p = jnp.asarray(b2, jnp.float32).reshape((1,))
    return w1p, b1p, w2p, b2p


def dense_msa_net(x, w1p, b1p, w2p, b2p, batch_tile=None, training=False,
                  single_buffer_weights=False):
    """x: (B, F) f32 or bf16; padded params from prepare_params. Returns (B, 1) f32."""
    if training:
        # TODO(synk): training-mode Dropout(0.2) not implemented (inference only).
        raise NotImplementedError("dense_msa_net implements inference only (Dropout == identity).")
    assert x.ndim == 2, x.shape
    B, F = x.shape
    assert w1p.shape[0] == F, (w1p.shape, F)
    Hp = w1p.shape[1]

    x_itemsize = jnp.dtype(x.dtype).itemsize
    w_itemsize = jnp.dtype(w1p.dtype).itemsize

    if batch_tile is None:
        TB = _pick_batch_tile(B, F, x_itemsize, w_itemsize)
    else:
        TB = int(batch_tile)
        if TB >= B:
            TB = B                                        # full dim -> always legal
        elif TB % 8 != 0:
            TB = min(_round_up(TB, 8), B)                 # enforce (8,128) BlockSpec constraint
    num_tiles = pl.cdiv(B, TB)

    cost = pl.CostEstimate(
        flops=2 * B * F * Hp + 2 * B * Hp,
        transcendentals=0,
        bytes_accessed=(B * F * x_itemsize
                        + w1p.size * w_itemsize
                        + (b1p.size + w2p.size + b2p.size) * 4
                        + B * 4),
    )

    # Weights/biases use constant index_maps -> fetched once, VMEM-resident.
    if single_buffer_weights:
        def _wspec(shape):
            return pl.BlockSpec(shape, lambda i: (0, 0), pipeline_mode=pl.Buffered(1))
    else:
        def _wspec(shape):
            return pl.BlockSpec(shape, lambda i: (0, 0))

    out = pl.pallas_call(
        dense_msa_kernel,
        out_shape=jax.ShapeDtypeStruct((num_tiles, 1, TB), jnp.float32),
        grid_spec=pltpu.PrefetchScalarGridSpec(
            num_scalar_prefetch=0,
            grid=(num_tiles,),
            in_specs=[
                pl.BlockSpec((TB, F), lambda i: (i, 0)),            # x: streamed per batch tile
                _wspec((F, Hp)),                                    # W1: VMEM-resident
                _wspec((1, Hp)),                                    # b1: VMEM-resident
                _wspec((1, Hp)),                                    # W2 row (f32): VMEM-resident
                pl.BlockSpec(memory_space=pltpu.MemorySpace.SMEM),  # b2 scalar in SMEM
            ],
            # Lane-dense (1, TB) rows of real outputs; leading grid dim squeezed.
            out_specs=pl.BlockSpec((None, 1, TB), lambda i: (i, 0, 0)),
        ),
        compiler_params=pltpu.CompilerParams(
            dimension_semantics=("parallel",),     # dual-TC sharding on v7x; neutral on v5e/v6e
            vmem_limit_bytes=48 * 1024 * 1024,     # fits v7x 64 MiB physical VMEM
        ),
        cost_estimate=cost,
    )(x, w1p, b1p, w2p, b2p)

    # Rows beyond B (ragged edge tile) are garbage by construction; slice away.
    return out.reshape(num_tiles * TB, 1)[:B]


def init_params(key, n_features: int):
    """Deterministic init mimicking torch.nn.Linear (uniform +/- 1/sqrt(fan_in))."""
    k1, k2, k3, k4 = jax.random.split(key, 4)
    bound1 = 1.0 / jnp.sqrt(jnp.float32(n_features))
    w1 = jax.random.uniform(k1, (n_features, 100), jnp.float32, -bound1, bound1)
    b1 = jax.random.uniform(k2, (100,), jnp.float32, -bound1, bound1)
    bound2 = 1.0 / jnp.sqrt(jnp.float32(100))
    w2 = jax.random.uniform(k3, (100, 1), jnp.float32, -bound2, bound2)
    b2 = jax.random.uniform(k4, (1,), jnp.float32, -bound2, bound2)
    return w1, b1, w2, b2


def _reference(x, w1, b1, w2, b2):
    return jnp.maximum(x @ w1 + b1, 0.0) @ w2 + b2


if __name__ == "__main__":
    key = jax.random.PRNGKey(0)
    kx, kx2, kp = jax.random.split(key, 3)

    n_features = 32
    w1, b1, w2, b2 = init_params(kp, n_features)

    # f32 params (tight reference tolerance).
    params = prepare_params(w1, b1, w2, b2, param_dtype=jnp.float32)

    # Case 1: tiny batch (single block, block == full array dims).
    batch = 2
    x = jax.random.normal(kx, (batch, n_features), jnp.float32)
    out = jax.block_until_ready(dense_msa_net(x, *params))
    ref = _reference(x, w1, b1, w2, b2)
    assert out.shape == (batch, 1), out.shape
    assert jnp.allclose(out, ref, atol=1e-4, rtol=1e-4), (out, ref)

    # Case 2: multi-block batch tiling with a ragged edge block (exercises the
    # streamed/pipelined path, edge masking, and the lane-dense output path).
    batch2 = 37
    x2 = jax.random.normal(kx2, (batch2, n_features), jnp.float32)
    out2 = jax.block_until_ready(dense_msa_net(x2, *params, batch_tile=16))
    ref2 = _reference(x2, w1, b1, w2, b2)
    assert out2.shape == (batch2, 1), out2.shape
    assert jnp.allclose(out2, ref2, atol=1e-4, rtol=1e-4), (out2, ref2)

    # Case 3: bf16 streaming path (x AND W1 stored bf16, f32 MXU accumulation).
    params_bf16 = prepare_params(w1, b1, w2, b2, param_dtype=jnp.bfloat16)
    x2_bf16 = x2.astype(jnp.bfloat16)
    out3 = jax.block_until_ready(dense_msa_net(x2_bf16, *params_bf16, batch_tile=16))
    ref3 = _reference(x2_bf16.astype(jnp.float32),
                      w1.astype(jnp.bfloat16).astype(jnp.float32), b1, w2, b2)
    assert out3.shape == (batch2, 1), out3.shape
    assert jnp.allclose(out3, ref3, atol=2e-3, rtol=2e-3), (out3, ref3)

    print("KERNEL_OK")
</pallas_src>

<mosaic_0001>
module attributes {stable_mosaic.version = 11 : i64} {
  func.func @dense_msa_kernel(%arg0: i32, %arg1: memref<2x32xf32, #tpu.memory_space<vmem>>, %arg2: memref<32x128xf32, #tpu.memory_space<vmem>>, %arg3: memref<1x128xf32, #tpu.memory_space<vmem>>, %arg4: memref<1x128xf32, #tpu.memory_space<vmem>>, %arg5: memref<1xf32, #tpu.memory_space<smem>>, %arg6: memref<1x1x2xf32, #tpu.memory_space<vmem>>) attributes {dimension_semantics = [#tpu.dimension_semantics<parallel>], iteration_bounds = array<i64: 1>, scalar_prefetch = 0 : i64, scratch_operands = 0 : i64, tpu.core_type = #tpu.core_type<tc>, window_params = [{transform_indices = @transform_0, window_bounds = array<i64: 2, 32>}, {pipeline_mode = #tpu.pipeline_mode<synchronous>, transform_indices = @transform_1, window_bounds = array<i64: 32, 128>}, {pipeline_mode = #tpu.pipeline_mode<synchronous>, transform_indices = @transform_2, window_bounds = array<i64: 1, 128>}, {pipeline_mode = #tpu.pipeline_mode<synchronous>, transform_indices = @transform_3, window_bounds = array<i64: 1, 128>}, {transform_indices = @transform_4, window_bounds = array<i64: 1>}, {transform_indices = @transform_5, window_bounds = array<i64: 1, 1, 2>}]} {
    %c0 = arith.constant 0 : index
    %c0_0 = arith.constant 0 : index
    %0 = vector.load %arg1[%c0, %c0_0] : memref<2x32xf32, #tpu.memory_space<vmem>>, vector<2x32xf32>
    %c0_1 = arith.constant 0 : index
    %c0_2 = arith.constant 0 : index
    %1 = vector.load %arg2[%c0_1, %c0_2] : memref<32x128xf32, #tpu.memory_space<vmem>>, vector<32x128xf32>
    %cst = arith.constant dense<0.000000e+00> : vector<2x128xf32>
    %2 = tpu.matmul %0, %1, %cst {dimension_numbers = #tpu.dot_dimension_numbers<[1], [0], [0], [1], [0, 0, 1, 1], [], []>} : vector<2x32xf32>, vector<32x128xf32>, vector<2x128xf32> -> vector<2x128xf32>
    %c0_3 = arith.constant 0 : index
    %c0_4 = arith.constant 0 : index
    %3 = vector.load %arg3[%c0_3, %c0_4] : memref<1x128xf32, #tpu.memory_space<vmem>>, vector<1x128xf32>
    %4 = vector.broadcast %3 : vector<1x128xf32> to vector<2x128xf32>
    %5 = arith.addf %2, %4 : vector<2x128xf32>
    %cst_5 = arith.constant 0.000000e+00 : f32
    %6 = vector.broadcast %cst_5 : f32 to vector<2x128xf32>
    %7 = arith.maximumf %5, %6 : vector<2x128xf32>
    %c0_6 = arith.constant 0 : index
    %c0_7 = arith.constant 0 : index
    %8 = vector.load %arg4[%c0_6, %c0_7] : memref<1x128xf32, #tpu.memory_space<vmem>>, vector<1x128xf32>
    %cst_8 = arith.constant dense<0.000000e+00> : vector<1x2xf32>
    %9 = tpu.matmul %8, %7, %cst_8 {dimension_numbers = #tpu.dot_dimension_numbers<[1], [1], [0], [0], [0, 0, 1, 0], [], []>} : vector<1x128xf32>, vector<2x128xf32>, vector<1x2xf32> -> vector<1x2xf32>
    %c0_9 = arith.constant 0 : index
    %10 = memref.load %arg5[%c0_9] : memref<1xf32, #tpu.memory_space<smem>>
    %11 = vector.broadcast %10 : f32 to vector<1x2xf32>
    %12 = arith.addf %9, %11 : vector<1x2xf32>
    %c0_10 = arith.constant 0 : index
    %c0_11 = arith.constant 0 : index
    %c0_12 = arith.constant 0 : index
    %13 = vector.load %arg6[%c0_10, %c0_11, %c0_12] : memref<1x1x2xf32, #tpu.memory_space<vmem>>, vector<1x1x2xf32>
    %14 = vector.shape_cast %13 : vector<1x1x2xf32> to vector<1x2xf32>
    %15 = vector.shape_cast %12 : vector<1x2xf32> to vector<1x1x2xf32>
    tpu.vector_store %arg6[%c0_10, %c0_11, %c0_12], %15 {strides = array<i32>} : memref<1x1x2xf32, #tpu.memory_space<vmem>>, vector<1x1x2xf32>,
    return
  }
  func.func @transform_0(%arg0: i32) -> (i32, i32) {
    %c0_i32 = arith.constant 0 : i32
    %c0_i32_0 = arith.constant 0 : i32
    return %arg0, %c0_i32 : i32, i32
  }
  func.func @transform_1(%arg0: i32) -> (i32, i32) {
    %c0_i32 = arith.constant 0 : i32
    %c0_i32_0 = arith.constant 0 : i32
    %c0_i32_1 = arith.constant 0 : i32
    return %c0_i32, %c0_i32_0 : i32, i32
  }
  func.func @transform_2(%arg0: i32) -> (i32, i32) {
    %c0_i32 = arith.constant 0 : i32
    %c0_i32_0 = arith.constant 0 : i32
    %c0_i32_1 = arith.constant 0 : i32
    return %c0_i32, %c0_i32_0 : i32, i32
  }
  func.func @transform_3(%arg0: i32) -> (i32, i32) {
    %c0_i32 = arith.constant 0 : i32
    %c0_i32_0 = arith.constant 0 : i32
    %c0_i32_1 = arith.constant 0 : i32
    return %c0_i32, %c0_i32_0 : i32, i32
  }
  func.func @transform_4(%arg0: i32) -> i32 {
    %c0_i32 = arith.constant 0 : i32
    %c0_i32_0 = arith.constant 0 : i32
    return %c0_i32 : i32
  }
  func.func @transform_5(%arg0: i32) -> (i32, i32, i32) {
    %c0_i32 = arith.constant 0 : i32
    %c0_i32_0 = arith.constant 0 : i32
    %c0_i32_1 = arith.constant 0 : i32
    return %arg0, %c0_i32, %c0_i32_0 : i32, i32, i32
  }
}

</mosaic_0001>

<bundles_post_ra>
// kernel: tpu_custom_call.1
= control target key start
LH: loop header
LB: loop body
LE: loop exit
PB: predicated region body
PF: predicated region fallthrough
CT: control target
= control target key end

     0   :  { %11 = vsyncpa [#allocation4], 0  ;;  %s342_s0 = inlined_call_operand.vmem [shape: f32[2,32], index: 0, kind: input, shape index: {}]   ;;  %s343_s1 = inlined_call_operand.hbm [shape: f32[32,128], index: 1, kind: input, shape index: {}]   ;;  %s344_s2 = inlined_call_operand.vmem [shape: f32[1,128], index: 2, kind: input, shape index: {}]   ;;  %s345_s3 = inlined_call_operand.vmem [shape: f32[1,128], index: 3, kind: input, shape index: {}]   ;;  %s346_s4 = inlined_call_operand.<no memory space> [shape: f32[1], index: 4, kind: input, shape index: {}]   ;;  %s347_s5 = inlined_call_operand.hbm [shape: f32[1,1,2], index: 5, kind: output, shape index: {}]  }
   0x1   :  { %12 = vsyncpa [#allocation5], 0  ;;  %s288_s18 = smov [#allocation3]  }
   0x2   :  { %s20_s19 = sshll.u32 %s288_s18, 4  ;;  %s21_s19 = int_to_ptr.vmem [resolvable:$true] %s20_s19 }
   0x3   :  { %s252_s20 = scalar_lea.vmem %s21_s19, 512  ;;  %p257_p1 = scmp.lt.s32.totalorder %s21_s19, %s21_s19 }
   0x4   :  { %p253_p0 = scmp.ne.s32.totalorder %s21_s19, %s252_s20  ;;  %p258_p2 = scmp.lt.s32.totalorder %s252_s20, %s252_s20 }
   0x6   :  { %p259_p3 = por %p258_p2, %p257_p1 }
   0x8   :  { %p260_p4 = pnand %p259_p3, %p253_p0 }
   0xa   :  { %263 = shalt.err (!%p260_p4)
}
   0xb   :  { %s289_s21 = smov 128   ;;  %s290_s22 = smov 8  }
   0xc   :  { %26 = dma.hbm_to_vmem [thread:$0]  %s343_s1, 512, %s21_s19, [#allocation4], %s289_s21, %s289_s21, %s290_s22  }
   0xd   :  { %284 = dma.done.wait [#allocation4], 512  }
   0xe   :  { %285 = vsyncadd [#allocation4], 4294966784  ;;  %v291_v0 = vmov 0.0   ;;  %vm292_vm0 = vmmov 0   ;;  %v40_v1 = vld [vmem:[#allocation3 + $0x18] sm:$0xff]  ;;  %v39_v2 = vld [vmem:[#allocation3 + $0x10] sm:$0xff]  ;;  %v125_v12 = vstv %s346_s4 }
   0xf   :  { %222 = vmatprep.subr.mxu0 %v291_v0  ;;  %230 = vmatprep.mubr.msk.f32.mxu0 %vm292_vm0, %v291_v0  ;;  %v38_v3 = vld [vmem:[#allocation3 + $0x8] sm:$0xff]  ;;  %v37_v4 = vld [vmem:[#allocation3] sm:$0xff]  ;;  %vm48_vm1 = vcmask 261120   ;;  %s293_s6 = smov [#allocation6]   ;;  %vm196_vm2 = vcmask 8192  }
  0x10   :  { %233 = vmatprep.subr.mxu1 %v291_v0  ;;  %235 = vmatprep.mubr.msk.f32.mxu1 %vm292_vm0, %v291_v0  ;;  %v36_v5 = vld [vmem:[%s342_s0] sm:$0x3]  ;;  %s204_s7 = sshll.u32 %s293_s6, 4  ;;  %s205_s7 = int_to_ptr.vmem [resolvable:$true] %s204_s7 }
  0x11   :  { %223 = vmatpush3.msra.mxu0 %v40_v1  ;;  %v213_v6 = vld [vmem:[%s344_s2] ss:$0 sm:$0xff]  ;;  %s264_s2 = scalar_lea.vmem %s205_s7, 16  ;;  %s268_s8 = scalar_lea.vmem %s205_s7, 32 }
  0x12   :  { %224 = vmatprep.subr.mxu0 %v291_v0  ;;  %v123_v11 = vld [vmem:[%s345_s3] sm:$0x1]  ;;  %p265_p5 = scmp.ne.s32.totalorder %s205_s7, %s264_s2  ;;  %p269_p6 = scmp.lt.s32.totalorder %s205_s7, %s205_s7 }
  0x13   :  { %225 = vmatpush3.msra.mxu0 %v39_v2  ;;  %p270_p7 = scmp.lt.s32.totalorder %s268_s8, %s264_s2 }
  0x14   :  { %226 = vmatprep.subr.mxu0 %v291_v0 }
  0x15   :  { %227 = vmatpush3.msra.mxu0 %v38_v3  ;;  %p271_p8 = por %p270_p7, %p269_p6 }
  0x16   :  { %228 = vmatprep.subr.mxu0 %v291_v0 }
  0x17   :  { %229 = vmatpush3.msra.mxu0 %v37_v4  ;;  %p272_p9 = pnand %p271_p8, %p265_p5 }
  0x18   :  { %231 = vmatmul.mubr.msk.f32.vlgmr.msra.gmra.mxu0 %vm48_vm1, %v36_v5 }
  0xd8   :  { %v118_v7 = vpop.f32.mrf.mxu0 }
  0xd9   :  { %v119_v8 = vadd.f32 %v213_v6, %v118_v7 }
  0xda   :  { %v232_v9 = vpop.f32.mrf.mxu0 }
  0xdb   :  { %v122_v10 = vmax.f32 %v119_v8, 0.0 }
  0xdd   :  { %234 = vmatpush3.xpose.msra.mxu1 %v122_v10 }
  0xe0   :  { %236 = vmatmul.mubr.f32.vlgmr.msra.gmra.mxu1 %v123_v11 }
 0x1a0   :  { %v192_v13 = vpop.f32.mrf.mxu1 }
 0x1a1   :  { %v193_v14 = vadd.f32 %v192_v13, %v125_v12 }
 0x1a2   :  { %v237_v15 = vpop.f32.mrf.mxu1 }
 0x1a3   :  { %197 = vst.msk [vmem:[#allocation6] sm:$0x1] %vm196_vm2, %v193_v14 }
 0x1a4   :  { %275 = shalt.err (!%p272_p9)
}
 0x1a5   :  { %207 = dma.vmem_to_hbm [thread:$0]  %s205_s7, 16, %s347_s5, [#allocation5]  }
 0x1a6   :  { %286 = dma.done.wait [#allocation5], 16  }
 0x1a7   :  { %287 = vsyncadd [#allocation5], 4294967280 }
 0x1a8   :  { %211 = vsyncpa [#allocation4], 1 }
 0x1a9   :  { %212 = vsyncpa [#allocation5], 1 }

</bundles_post_ra>
